<compile_context>
chip_gen: v6e
topology: v6e:2x2x1
jax: 0.10.0
libtpu: 0.0.40
codegen_flags: <defaults>
</compile_context>

<pallas_src>
import functools

import jax
import jax.numpy as jnp
from jax import lax
from jax.experimental import pallas as pl
from jax.experimental.pallas import tpu as pltpu


def _subset_kernel(x_ref, w_ref, b_ref, o_ref):
    # x_ref: (TM, D) VMEM, w_ref: (1, D) VMEM, b_ref: (1, 1) SMEM, o_ref: (1, TM).
    # Contract over D with x as the (transposed) RHS so the MXU emits a
    # lane-dense (1, TM) row -- no (TM, 1) column / masked stores.
    logits = lax.dot_general(
        w_ref[...], x_ref[...],
        dimension_numbers=(((1,), (1,)), ((), ())),
        preferred_element_type=jnp.float32,
    )                                                 # (1, TM) f32
    logits = logits + b_ref[0, 0]                     # scalar bias from SMEM
    o_ref[...] = jax.nn.sigmoid(logits).astype(o_ref.dtype)   # EUP sigmoid + cast


def _choose_row_tile(n_rows, d, itemsize):
    """Row tile such that the x tile is ~4 MiB (grid-step overhead amortized),
    never exceeds the padded row count, and double-buffers inside scoped VMEM."""
    target_tile_bytes = 4 * 1024 * 1024               # -> 8 MiB double-buffered
    budget_bytes = 24 * 1024 * 1024                   # headroom under 32 MiB scoped VMEM
    row_bytes = max(1, d * itemsize)
    rows = min(
        target_tile_bytes // row_bytes,               # DMA-efficiency target
        budget_bytes // (2 * row_bytes),              # 2 in-flight x buffers must fit
        pl.cdiv(n_rows, 128) * 128,                   # don't over-pad small inputs
    )
    return int(max(128, (rows // 128) * 128))


@functools.partial(jax.jit, static_argnames=("row_tile",))
def simple_subset_forward(x, w, b, *, row_tile=None):
    """SimpleSubset forward: sigmoid(x @ W^T + b) applied per set element.

    x: (B, S, D); w: (1, D) (nn.Linear weight layout); b: (1,). Returns (B, S, 1).
    """
    B, S, D = x.shape
    N = B * S
    itemsize = jnp.dtype(x.dtype).itemsize

    if row_tile is None:
        row_tile = _choose_row_tile(N, D, itemsize)
    row_tile = int(max(128, (row_tile // 128) * 128))

    grid_m = pl.cdiv(N, row_tile)
    n_pad = grid_m * row_tile

    x2 = x.reshape(N, D)
    if n_pad != N:                                    # ragged rows -> pad last tile
        x2 = jnp.pad(x2, ((0, n_pad - N), (0, 0)))
    w2 = w.astype(x.dtype)
    b2 = jnp.reshape(b, (1, 1)).astype(jnp.float32)

    tile_bytes = row_tile * D * itemsize
    vmem_limit = int(max(32 * 1024 * 1024, 3 * tile_bytes + (1 << 20)))

    out = pl.pallas_call(
        _subset_kernel,
        out_shape=jax.ShapeDtypeStruct((1, n_pad), x.dtype),
        grid=(grid_m,),
        in_specs=[
            pl.BlockSpec((row_tile, D), lambda i: (i, 0)),        # x rows, pipelined
            pl.BlockSpec((1, D), lambda i: (0, 0)),               # weight, resident
            pl.BlockSpec(memory_space=pltpu.MemorySpace.SMEM),    # bias scalar
        ],
        out_specs=pl.BlockSpec((1, row_tile), lambda i: (0, i)),  # lane-dense slab
        compiler_params=pltpu.CompilerParams(
            dimension_semantics=("parallel",),
            vmem_limit_bytes=vmem_limit,
        ),
    )(x2, w2, b2)

    return out[0, :N].reshape(B, S, 1)


def _reference(x, w, b):
    return jax.nn.sigmoid(jnp.einsum("bsd,od->bso", x, w) + b)


if __name__ == "__main__":
    key = jax.random.PRNGKey(0)
    B, S, D = 2, 8, 32  # batch=2, set_size=8, input_dim=32

    kx, kw, kb = jax.random.split(key, 3)
    x = jax.random.normal(kx, (B, S, D), dtype=jnp.float32)

    # Deterministic PyTorch-style nn.Linear(D, 1) init: U(-1/sqrt(D), 1/sqrt(D)).
    bound = 1.0 / (D ** 0.5)
    w = jax.random.uniform(kw, (1, D), jnp.float32, -bound, bound)  # (out=1, in=D)
    b = jax.random.uniform(kb, (1,), jnp.float32, -bound, bound)

    y = jax.block_until_ready(simple_subset_forward(x, w, b))

    y_ref = _reference(x, w, b)
    assert y.shape == (B, S, 1)
    assert jnp.allclose(y, y_ref, atol=1e-5, rtol=1e-5)

    print("KERNEL_OK")
</pallas_src>

<mosaic_0001>
module attributes {stable_mosaic.version = 11 : i64} {
  func.func @_subset_kernel(%arg0: i32, %arg1: memref<128x32xf32, #tpu.memory_space<vmem>>, %arg2: memref<1x32xf32, #tpu.memory_space<vmem>>, %arg3: memref<1x1xf32, #tpu.memory_space<smem>>, %arg4: memref<1x128xf32, #tpu.memory_space<vmem>>) attributes {dimension_semantics = [#tpu.dimension_semantics<parallel>], iteration_bounds = array<i64: 1>, scalar_prefetch = 0 : i64, scratch_operands = 0 : i64, tpu.core_type = #tpu.core_type<tc>, window_params = [{transform_indices = @transform_0, window_bounds = array<i64: 128, 32>}, {pipeline_mode = #tpu.pipeline_mode<synchronous>, transform_indices = @transform_1, window_bounds = array<i64: 1, 32>}, {transform_indices = @transform_2, window_bounds = array<i64: 1, 1>}, {transform_indices = @transform_3, window_bounds = array<i64: 1, 128>}]} {
    %c0 = arith.constant 0 : index
    %c0_0 = arith.constant 0 : index
    %0 = vector.load %arg2[%c0, %c0_0] : memref<1x32xf32, #tpu.memory_space<vmem>>, vector<1x32xf32>
    %c0_1 = arith.constant 0 : index
    %c0_2 = arith.constant 0 : index
    %1 = vector.load %arg1[%c0_1, %c0_2] : memref<128x32xf32, #tpu.memory_space<vmem>>, vector<128x32xf32>
    %cst = arith.constant dense<0.000000e+00> : vector<1x128xf32>
    %2 = tpu.matmul %0, %1, %cst {dimension_numbers = #tpu.dot_dimension_numbers<[1], [1], [0], [0], [0, 0, 1, 0], [], []>} : vector<1x32xf32>, vector<128x32xf32>, vector<1x128xf32> -> vector<1x128xf32>
    %c0_3 = arith.constant 0 : index
    %c0_4 = arith.constant 0 : index
    %3 = memref.load %arg3[%c0_3, %c0_4] : memref<1x1xf32, #tpu.memory_space<smem>>
    %4 = vector.broadcast %3 : f32 to vector<1x128xf32>
    %5 = arith.addf %2, %4 : vector<1x128xf32>
    %6 = arith.negf %5 : vector<1x128xf32>
    %7 = math.exp %6 : vector<1x128xf32>
    %cst_5 = arith.constant 1.000000e+00 : f32
    %8 = vector.broadcast %cst_5 : f32 to vector<1x128xf32>
    %9 = arith.addf %8, %7 : vector<1x128xf32>
    %10 = arith.divf %8, %9 : vector<1x128xf32>
    %c0_6 = arith.constant 0 : index
    %c0_7 = arith.constant 0 : index
    %11 = vector.load %arg4[%c0_6, %c0_7] : memref<1x128xf32, #tpu.memory_space<vmem>>, vector<1x128xf32>
    tpu.vector_store %arg4[%c0_6, %c0_7], %10 {strides = array<i32>} : memref<1x128xf32, #tpu.memory_space<vmem>>, vector<1x128xf32>,
    return
  }
  func.func @transform_0(%arg0: i32) -> (i32, i32) {
    %c0_i32 = arith.constant 0 : i32
    %c0_i32_0 = arith.constant 0 : i32
    return %arg0, %c0_i32 : i32, i32
  }
  func.func @transform_1(%arg0: i32) -> (i32, i32) {
    %c0_i32 = arith.constant 0 : i32
    %c0_i32_0 = arith.constant 0 : i32
    %c0_i32_1 = arith.constant 0 : i32
    return %c0_i32, %c0_i32_0 : i32, i32
  }
  func.func @transform_2(%arg0: i32) -> (i32, i32) {
    %c0_i32 = arith.constant 0 : i32
    %c0_i32_0 = arith.constant 0 : i32
    %c0_i32_1 = arith.constant 0 : i32
    return %c0_i32, %c0_i32_0 : i32, i32
  }
  func.func @transform_3(%arg0: i32) -> (i32, i32) {
    %c0_i32 = arith.constant 0 : i32
    %c0_i32_0 = arith.constant 0 : i32
    return %c0_i32, %arg0 : i32, i32
  }
}

</mosaic_0001>

<bundles_post_ra>
// kernel: squeeze.1
= control target key start
LH: loop header
LB: loop body
LE: loop exit
PB: predicated region body
PF: predicated region fallthrough
CT: control target
= control target key end

     0   :  { %s77_s0 = inlined_call_operand.vmem [shape: f32[16], index: 0, kind: input, shape index: {}]   ;;  %s78_s1 = inlined_call_operand.hbm [shape: f32[2,8,1], index: 1, kind: output, shape index: {}]  }
   0x1   :  { %v6_v0 = vld [vmem:[%s77_s0] sm:$0x1] }
   0x2   :  { %2 = vsyncpa [#allocation1], 0  ;;  %7 = vst [vmem:[#allocation3] sm:$0x1] %v6_v0  ;;  %vm9_vm0 = vcmask 64512   ;;  %s59_s0 = smov 120  }
   0x3   :  { %s60_s8 = smov [#allocation0]  }
   0x4   :  { %s29_s9 = sshll.u32 %s60_s8, 4  ;;  %s30_s9 = int_to_ptr.vmem [resolvable:$true] %s29_s9 }
   0x5   :  { %s37_s10 = scalar_lea.vmem %s30_s9, 32  ;;  %p42_p1 = scmp.lt.s32.totalorder %s30_s9, %s30_s9 }
   0x6   :  { %p38_p0 = scmp.ne.s32.totalorder %s30_s9, %s37_s10  ;;  %p43_p2 = scmp.lt.s32.totalorder %s37_s10, %s37_s10 }
   0x8   :  { %p44_p3 = por %p43_p2, %p42_p1 }
   0x9   :  { %v11_v1 = vld [vmem:[#allocation3] sm:$0x1]  }
   0xa   :  { %v8_v2 = vld [vmem:[#allocation3] sm:$0x1]   ;;  %12 = vrot.lane.b32.xlu0 %v11_v1, %s59_s0  ;;  %p45_p4 = pnand %p44_p3, %p38_p0 }
   0xb   :  { %10 = vst.msk [vmem:[#allocation2] sm:$0x1] %vm9_vm0, %v8_v2  }
  0x7c   :  { %v13_v3 = vpop.permute.xlu0 %12  }
  0x7d   :  { %16 = vst.msk [vmem:[#allocation2 + $0x1] sm:$0x1] %vm9_vm0, %v13_v3  }
  0x84   :  { %v21_v4 = vld [vmem:[#allocation2] sm:$0x3] }
  0x85   :  { %24 = vst [vmem:[#allocation0] sm:$0x3] %v21_v4 }
  0x86   :  { %48 = shalt.err (!%p45_p4)
}
  0x87   :  { %32 = dma.vmem_to_hbm [thread:$0]  %s30_s9, 32, %s78_s1, [#allocation1]  }
  0x88   :  { %57 = dma.done.wait [#allocation1], 32  }
  0x89   :  { %58 = vsyncadd [#allocation1], 4294967264 }
  0x8a   :  { %34 = vsyncpa [#allocation1], 1 }

// kernel: simple_subset_forward.1
= control target key start
LH: loop header
LB: loop body
LE: loop exit
PB: predicated region body
PF: predicated region fallthrough
CT: control target
= control target key end

     0   :  { %vm34_vm0 = vcmask 261120   ;;  %v243_v0 = vmov 0.0   ;;  %vm244_vm1 = vmmov 0   ;;  %s339_s0 = inlined_call_operand.vmem [shape: f32[128,32], index: 0, kind: input, shape index: {}]   ;;  %s340_s1 = inlined_call_operand.vmem [shape: f32[1,32], index: 1, kind: input, shape index: {}]   ;;  %s341_s2 = inlined_call_operand.<no memory space> [shape: f32[1,1], index: 2, kind: input, shape index: {}]   ;;  %s342_s3 = inlined_call_operand.vmem [shape: f32[1,128], index: 3, kind: output, shape index: {}]  }
   0x1   :  { %202 = vmatprep.subr.mxu0 %v243_v0  ;;  %v31_v1 = vld [vmem:[%s339_s0 + $0x78] sm:$0xff]  ;;  %234 = vmatprep.mubr.msk.f32.mxu0 %vm244_vm1, %v243_v0  ;;  %v30_v2 = vld [vmem:[%s339_s0 + $0x70] sm:$0xff]  ;;  %v29_v3 = vld [vmem:[%s339_s0 + $0x68] sm:$0xff]  ;;  %v33_v18 = vstv %s341_s2 }
   0x2   :  { %203 = vmatpush3.xpose.msk.msra.mxu0 %vm34_vm0, %v31_v1  ;;  %v28_v4 = vld [vmem:[%s339_s0 + $0x60] sm:$0xff]  ;;  %v27_v5 = vld [vmem:[%s339_s0 + $0x58] sm:$0xff]  ;;  %v26_v6 = vld [vmem:[%s339_s0 + $0x50] sm:$0xff] }
   0x3   :  { %204 = vmatprep.subr.mxu0 %v243_v0  ;;  %v25_v7 = vld [vmem:[%s339_s0 + $0x48] sm:$0xff]  ;;  %v24_v8 = vld [vmem:[%s339_s0 + $0x40] sm:$0xff]  ;;  %v23_v9 = vld [vmem:[%s339_s0 + $0x38] sm:$0xff] }
   0x4   :  { %v22_v10 = vld [vmem:[%s339_s0 + $0x30] sm:$0xff]  ;;  %v21_v11 = vld [vmem:[%s339_s0 + $0x28] sm:$0xff]  ;;  %v20_v12 = vld [vmem:[%s339_s0 + $0x20] sm:$0xff] }
   0x5   :  { %v19_v13 = vld [vmem:[%s339_s0 + $0x18] sm:$0xff]  ;;  %v18_v14 = vld [vmem:[%s339_s0 + $0x10] sm:$0xff]  ;;  %v17_v15 = vld [vmem:[%s339_s0 + $0x8] sm:$0xff] }
   0x6   :  { %205 = vmatpush3.xpose.msk.msra.mxu0 %vm34_vm0, %v30_v2  ;;  %v16_v16 = vld [vmem:[%s339_s0] sm:$0xff] }
   0x7   :  { %206 = vmatprep.subr.mxu0 %v243_v0  ;;  %v15_v17 = vld [vmem:[%s340_s1] sm:$0x1] }
   0xa   :  { %207 = vmatpush3.xpose.msk.msra.mxu0 %vm34_vm0, %v29_v3 }
   0xb   :  { %208 = vmatprep.subr.mxu0 %v243_v0 }
   0xe   :  { %209 = vmatpush3.xpose.msk.msra.mxu0 %vm34_vm0, %v28_v4 }
   0xf   :  { %210 = vmatprep.subr.mxu0 %v243_v0 }
  0x12   :  { %211 = vmatpush3.xpose.msk.msra.mxu0 %vm34_vm0, %v27_v5 }
  0x13   :  { %212 = vmatprep.subr.mxu0 %v243_v0 }
  0x16   :  { %213 = vmatpush3.xpose.msk.msra.mxu0 %vm34_vm0, %v26_v6 }
  0x17   :  { %214 = vmatprep.subr.mxu0 %v243_v0 }
  0x1a   :  { %215 = vmatpush3.xpose.msk.msra.mxu0 %vm34_vm0, %v25_v7 }
  0x1b   :  { %216 = vmatprep.subr.mxu0 %v243_v0 }
  0x1e   :  { %217 = vmatpush3.xpose.msk.msra.mxu0 %vm34_vm0, %v24_v8 }
  0x1f   :  { %218 = vmatprep.subr.mxu0 %v243_v0 }
  0x22   :  { %219 = vmatpush3.xpose.msk.msra.mxu0 %vm34_vm0, %v23_v9 }
  0x23   :  { %220 = vmatprep.subr.mxu0 %v243_v0 }
  0x26   :  { %221 = vmatpush3.xpose.msk.msra.mxu0 %vm34_vm0, %v22_v10 }
  0x27   :  { %222 = vmatprep.subr.mxu0 %v243_v0 }
  0x2a   :  { %223 = vmatpush3.xpose.msk.msra.mxu0 %vm34_vm0, %v21_v11 }
  0x2b   :  { %224 = vmatprep.subr.mxu0 %v243_v0 }
  0x2e   :  { %225 = vmatpush3.xpose.msk.msra.mxu0 %vm34_vm0, %v20_v12 }
  0x2f   :  { %226 = vmatprep.subr.mxu0 %v243_v0 }
  0x32   :  { %227 = vmatpush3.xpose.msk.msra.mxu0 %vm34_vm0, %v19_v13 }
  0x33   :  { %228 = vmatprep.subr.mxu0 %v243_v0 }
  0x36   :  { %229 = vmatpush3.xpose.msk.msra.mxu0 %vm34_vm0, %v18_v14 }
  0x37   :  { %230 = vmatprep.subr.mxu0 %v243_v0 }
  0x3a   :  { %231 = vmatpush3.xpose.msk.msra.mxu0 %vm34_vm0, %v17_v15 }
  0x3b   :  { %232 = vmatprep.subr.mxu0 %v243_v0 }
  0x3e   :  { %233 = vmatpush3.xpose.msk.msra.mxu0 %vm34_vm0, %v16_v16 }
  0x41   :  { %235 = vmatmul.mubr.msk.f32.vlgmr.msra.gmra.mxu0 %vm34_vm0, %v15_v17 }
 0x101   :  { %v152_v19 = vpop.f32.mrf.mxu0 }
 0x102   :  { %v153_v20 = vadd.f32 %v152_v19, %v33_v18 }
 0x103   :  { %v236_v21 = vpop.f32.mrf.mxu0 }
 0x104   :  { %v184_v22 = vmul.f32 -1.442695, %v153_v20 }
 0x106   :  { %239 = vpow2.f32 %v184_v22 }
 0x113   :  { %v240_v23 = vpop.eup %239 }
 0x114   :  { %v159_v24 = vadd.f32 1.0, %v240_v23 }
 0x116   :  { %241 = vrcp.f32 %v159_v24 }
 0x123   :  { %v242_v25 = vpop.eup %241 }
 0x124   :  { %162 = vst [vmem:[%s342_s3] sm:$0x1] %v242_v25 }

</bundles_post_ra>
